<compile_context>
chip_gen: v7x
topology: tpu7x:2x2x1
jax: 0.10.0
libtpu: 0.0.40
codegen_flags: <defaults>
</compile_context>

<pallas_src>
import jax
import jax.numpy as jnp
from jax import lax
from jax.experimental import pallas as pl
from jax.experimental.pallas import tpu as pltpu

EPS = 1e-5  # nn.BatchNorm1d default


def _conv_tile(x_ref, w_ref):
    """One row-tile of Conv1d(k=3, pad=1) as a single im2col MXU matmul.

    x_ref: (TN, L, Cin) f32 (channels-last), w_ref: (3*Cin, Cout) bf16.
    Returns the conv output for the tile as (TN*L, Cout) f32.
    """
    x = x_ref[...].astype(jnp.bfloat16)                      # bf16 MXU operands
    TN, L, Cin = x_ref.shape
    z = jnp.zeros((TN, 1, Cin), jnp.bfloat16)
    x_pad = jnp.concatenate([z, x, z], axis=1)               # in-kernel padding=1
    x_col = jnp.concatenate(                                 # im2col: taps on K
        [x_pad[:, 0:L, :],          # tap k=0  -> x[l-1]
         x_pad[:, 1:L + 1, :],      # tap k=1  -> x[l]
         x_pad[:, 2:L + 2, :]],     # tap k=2  -> x[l+1]
        axis=-1)                                             # (TN, L, 3*Cin)
    x_col = x_col.reshape(TN * L, 3 * Cin)                   # single large-M dot
    return jnp.dot(x_col, w_ref[...], preferred_element_type=jnp.float32)


def _stats_kernel(x_ref, w_ref, stats_ref):
    # stats_ref: (8, Cout) per-tile partials: row 0 = sum, row 1 = sum of squares.
    acc = _conv_tile(x_ref, w_ref)                           # (rows, Cout) f32
    s = jnp.sum(acc, axis=0, keepdims=True)
    ss = jnp.sum(acc * acc, axis=0, keepdims=True)
    pad = jnp.zeros((6, acc.shape[1]), jnp.float32)
    stats_ref[...] = jnp.concatenate([s, ss, pad], axis=0)


def _norm_kernel(x_ref, w_ref, scale_ref, shift_ref, o_ref):
    acc = _conv_tile(x_ref, w_ref)                           # (rows, Cout) f32
    y = jnp.maximum(acc * scale_ref[...] + shift_ref[...], 0.0)   # fused BN+ReLU
    TN, L, _ = x_ref.shape
    o_ref[...] = y.reshape(TN, L, -1).astype(o_ref.dtype)


def _pick_batch_tile(n, l, target_rows=1024):
    """Largest divisor of n whose tile is <= ~target_rows rows (>= 1 sequence)."""
    tn = 1
    for t in range(1, n + 1):
        if n % t == 0 and t * l <= max(l, target_rows):
            tn = t
    return tn


@jax.jit
def conv_layer_forward(x_ncl, conv_w, gamma, beta):
    """x_ncl: (N, Cin, L) f32 (PyTorch NCL layout). Returns (N, Cout, L) f32."""
    N, Cin, L = x_ncl.shape
    Cout = conv_w.shape[0]
    TN = _pick_batch_tile(N, L)
    num_tiles = N // TN

    # Layout glue: channels-last for the kernels (no jnp.pad — padding in-kernel).
    x_nlc = jnp.transpose(x_ncl, (0, 2, 1))                  # (N, L, Cin)
    # w2[k*Cin + ci, co] = conv_w[co, ci, k]  (tap-major im2col weight), bf16.
    w2 = jnp.transpose(conv_w, (2, 1, 0)).reshape(3 * Cin, Cout).astype(jnp.bfloat16)

    parallel = pltpu.CompilerParams(dimension_semantics=("parallel",))

    # ---- pass 1: conv + per-channel sum / sum-of-squares partials -----------
    partials = pl.pallas_call(
        _stats_kernel,
        out_shape=jax.ShapeDtypeStruct((num_tiles * 8, Cout), jnp.float32),
        grid=(num_tiles,),
        in_specs=[
            pl.BlockSpec((TN, L, Cin), lambda i: (i, 0, 0)),
            pl.BlockSpec((3 * Cin, Cout), lambda i: (0, 0)),
        ],
        out_specs=pl.BlockSpec((8, Cout), lambda i: (i, 0)),
        compiler_params=parallel,
    )(x_nlc, w2)

    p = partials.reshape(num_tiles, 8, Cout)
    count = jnp.float32(N * L)
    mean = jnp.sum(p[:, 0, :], axis=0) / count
    var = jnp.maximum(jnp.sum(p[:, 1, :], axis=0) / count - mean * mean, 0.0)
    # Fused BN affine (biased variance, train-mode forward, f32).
    scale = gamma.astype(jnp.float32) * lax.rsqrt(var + EPS)
    shift = beta.astype(jnp.float32) - mean * scale
    scale2 = scale.reshape(1, Cout)
    shift2 = shift.reshape(1, Cout)
    # TODO(synk): training-mode BatchNorm1d also updates running_mean/running_var
    # (unbiased) as a buffer side effect; not emitted here (forward output only).

    # ---- pass 2: conv (recomputed) + fused normalize + ReLU ------------------
    out_nlc = pl.pallas_call(
        _norm_kernel,
        out_shape=jax.ShapeDtypeStruct((N, L, Cout), jnp.float32),
        grid=(num_tiles,),
        in_specs=[
            pl.BlockSpec((TN, L, Cin), lambda i: (i, 0, 0)),
            pl.BlockSpec((3 * Cin, Cout), lambda i: (0, 0)),
            pl.BlockSpec((1, Cout), lambda i: (0, 0)),
            pl.BlockSpec((1, Cout), lambda i: (0, 0)),
        ],
        out_specs=pl.BlockSpec((TN, L, Cout), lambda i: (i, 0, 0)),
        compiler_params=parallel,
    )(x_nlc, w2, scale2, shift2)

    return jnp.transpose(out_nlc, (0, 2, 1))                 # (N, Cout, L)


if __name__ == "__main__":
    key = jax.random.PRNGKey(0)
    k1, k2, k3, k4 = jax.random.split(key, 4)

    N, Cin, Cout, L = 2, 16, 32, 16
    x = jax.random.normal(k1, (N, Cin, L), jnp.float32)
    # nn.Conv1d weight shape: (Cout, Cin, 3).
    conv_w = jax.random.normal(k2, (Cout, Cin, 3), jnp.float32) * 0.1
    gamma = 1.0 + 0.1 * jax.random.normal(k3, (Cout,), jnp.float32)
    beta = 0.1 * jax.random.normal(k4, (Cout,), jnp.float32)

    out = jax.block_until_ready(conv_layer_forward(x, conv_w, gamma, beta))

    # Pure-JAX f32 reference (PyTorch semantics: Conv1d + train-mode BN + ReLU).
    ref_conv = lax.conv_general_dilated(
        x, conv_w, window_strides=(1,), padding=((1, 1),),
        dimension_numbers=("NCW", "OIW", "NCW"),
    )
    mean = jnp.mean(ref_conv, axis=(0, 2), keepdims=True)
    var = jnp.mean((ref_conv - mean) ** 2, axis=(0, 2), keepdims=True)
    ref = jnp.maximum(
        (ref_conv - mean) * lax.rsqrt(var + EPS) * gamma[None, :, None]
        + beta[None, :, None],
        0.0,
    )

    assert out.shape == (N, Cout, L)
    # bf16 MXU operands -> loosened tolerance vs the pure-f32 reference.
    assert jnp.allclose(out, ref, atol=2e-2, rtol=2e-2), "mismatch vs reference"

    print("KERNEL_OK")
</pallas_src>

<mosaic_0001>
module attributes {stable_mosaic.version = 11 : i64} {
  func.func @_stats_kernel(%arg0: i32, %arg1: memref<2x16x16xf32, #tpu.memory_space<vmem>>, %arg2: memref<48x32xbf16, #tpu.memory_space<vmem>>, %arg3: memref<8x32xf32, #tpu.memory_space<vmem>>) attributes {dimension_semantics = [#tpu.dimension_semantics<parallel>], iteration_bounds = array<i64: 1>, scalar_prefetch = 0 : i64, scratch_operands = 0 : i64, tpu.core_type = #tpu.core_type<tc>, window_params = [{transform_indices = @transform_0, window_bounds = array<i64: 2, 16, 16>}, {pipeline_mode = #tpu.pipeline_mode<synchronous>, transform_indices = @transform_1, window_bounds = array<i64: 48, 32>}, {transform_indices = @transform_2, window_bounds = array<i64: 8, 32>}]} {
    %c0 = arith.constant 0 : index
    %c0_0 = arith.constant 0 : index
    %c0_1 = arith.constant 0 : index
    %0 = vector.load %arg1[%c0, %c0_0, %c0_1] : memref<2x16x16xf32, #tpu.memory_space<vmem>>, vector<2x16x16xf32>
    %1 = arith.truncf %0 : vector<2x16x16xf32> to vector<2x16x16xbf16>
    %cst = arith.constant 0.000000e+00 : bf16
    %2 = vector.broadcast %cst : bf16 to vector<2x1x16xbf16>
    %3 = tpu.concatenate %2, %1, %2 in 1 : vector<2x1x16xbf16>, vector<2x16x16xbf16>, vector<2x1x16xbf16> -> vector<2x18x16xbf16>
    %4 = vector.extract_strided_slice %3 {offsets = [0, 0, 0], sizes = [2, 16, 16], strides = [1, 1, 1]} : vector<2x18x16xbf16> to vector<2x16x16xbf16>
    %5 = vector.extract_strided_slice %3 {offsets = [0, 1, 0], sizes = [2, 16, 16], strides = [1, 1, 1]} : vector<2x18x16xbf16> to vector<2x16x16xbf16>
    %6 = vector.extract_strided_slice %3 {offsets = [0, 2, 0], sizes = [2, 16, 16], strides = [1, 1, 1]} : vector<2x18x16xbf16> to vector<2x16x16xbf16>
    %7 = tpu.concatenate %4, %5, %6 in 2 : vector<2x16x16xbf16>, vector<2x16x16xbf16>, vector<2x16x16xbf16> -> vector<2x16x48xbf16>
    %8 = vector.shape_cast %7 : vector<2x16x48xbf16> to vector<32x48xbf16>
    %c0_2 = arith.constant 0 : index
    %c0_3 = arith.constant 0 : index
    %9 = vector.load %arg2[%c0_2, %c0_3] : memref<48x32xbf16, #tpu.memory_space<vmem>>, vector<48x32xbf16>
    %cst_4 = arith.constant dense<0.000000e+00> : vector<32x32xf32>
    %10 = tpu.matmul %8, %9, %cst_4 {dimension_numbers = #tpu.dot_dimension_numbers<[1], [0], [0], [1], [0, 0, 1, 1], [], []>} : vector<32x48xbf16>, vector<48x32xbf16>, vector<32x32xf32> -> vector<32x32xf32>
    %cst_5 = arith.constant dense<0.000000e+00> : vector<32xf32>
    %11 = vector.multi_reduction <add>, %10, %cst_5 [0] : vector<32x32xf32> to vector<32xf32>
    %12 = vector.shape_cast %11 : vector<32xf32> to vector<1x32xf32>
    %13 = arith.mulf %10, %10 : vector<32x32xf32>
    %cst_6 = arith.constant dense<0.000000e+00> : vector<32xf32>
    %14 = vector.multi_reduction <add>, %13, %cst_6 [0] : vector<32x32xf32> to vector<32xf32>
    %15 = vector.shape_cast %14 : vector<32xf32> to vector<1x32xf32>
    %cst_7 = arith.constant 0.000000e+00 : f32
    %16 = vector.broadcast %cst_7 : f32 to vector<6x32xf32>
    %17 = tpu.concatenate %12, %15, %16 in 0 : vector<1x32xf32>, vector<1x32xf32>, vector<6x32xf32> -> vector<8x32xf32>
    %c0_8 = arith.constant 0 : index
    %c0_9 = arith.constant 0 : index
    %18 = vector.load %arg3[%c0_8, %c0_9] : memref<8x32xf32, #tpu.memory_space<vmem>>, vector<8x32xf32>
    tpu.vector_store %arg3[%c0_8, %c0_9], %17 {strides = array<i32>} : memref<8x32xf32, #tpu.memory_space<vmem>>, vector<8x32xf32>,
    return
  }
  func.func @transform_0(%arg0: i32) -> (i32, i32, i32) {
    %c0_i32 = arith.constant 0 : i32
    %c0_i32_0 = arith.constant 0 : i32
    %c0_i32_1 = arith.constant 0 : i32
    return %arg0, %c0_i32, %c0_i32_0 : i32, i32, i32
  }
  func.func @transform_1(%arg0: i32) -> (i32, i32) {
    %c0_i32 = arith.constant 0 : i32
    %c0_i32_0 = arith.constant 0 : i32
    %c0_i32_1 = arith.constant 0 : i32
    return %c0_i32, %c0_i32_0 : i32, i32
  }
  func.func @transform_2(%arg0: i32) -> (i32, i32) {
    %c0_i32 = arith.constant 0 : i32
    %c0_i32_0 = arith.constant 0 : i32
    return %arg0, %c0_i32 : i32, i32
  }
}

module attributes {stable_mosaic.version = 11 : i64} {
  func.func @_norm_kernel(%arg0: i32, %arg1: memref<2x16x16xf32, #tpu.memory_space<vmem>>, %arg2: memref<48x32xbf16, #tpu.memory_space<vmem>>, %arg3: memref<1x32xf32, #tpu.memory_space<vmem>>, %arg4: memref<1x32xf32, #tpu.memory_space<vmem>>, %arg5: memref<2x16x32xf32, #tpu.memory_space<vmem>>) attributes {dimension_semantics = [#tpu.dimension_semantics<parallel>], iteration_bounds = array<i64: 1>, scalar_prefetch = 0 : i64, scratch_operands = 0 : i64, tpu.core_type = #tpu.core_type<tc>, window_params = [{transform_indices = @transform_0, window_bounds = array<i64: 2, 16, 16>}, {pipeline_mode = #tpu.pipeline_mode<synchronous>, transform_indices = @transform_1, window_bounds = array<i64: 48, 32>}, {pipeline_mode = #tpu.pipeline_mode<synchronous>, transform_indices = @transform_2, window_bounds = array<i64: 1, 32>}, {pipeline_mode = #tpu.pipeline_mode<synchronous>, transform_indices = @transform_3, window_bounds = array<i64: 1, 32>}, {transform_indices = @transform_4, window_bounds = array<i64: 2, 16, 32>}]} {
    %c0 = arith.constant 0 : index
    %c0_0 = arith.constant 0 : index
    %c0_1 = arith.constant 0 : index
    %0 = vector.load %arg1[%c0, %c0_0, %c0_1] : memref<2x16x16xf32, #tpu.memory_space<vmem>>, vector<2x16x16xf32>
    %1 = arith.truncf %0 : vector<2x16x16xf32> to vector<2x16x16xbf16>
    %cst = arith.constant 0.000000e+00 : bf16
    %2 = vector.broadcast %cst : bf16 to vector<2x1x16xbf16>
    %3 = tpu.concatenate %2, %1, %2 in 1 : vector<2x1x16xbf16>, vector<2x16x16xbf16>, vector<2x1x16xbf16> -> vector<2x18x16xbf16>
    %4 = vector.extract_strided_slice %3 {offsets = [0, 0, 0], sizes = [2, 16, 16], strides = [1, 1, 1]} : vector<2x18x16xbf16> to vector<2x16x16xbf16>
    %5 = vector.extract_strided_slice %3 {offsets = [0, 1, 0], sizes = [2, 16, 16], strides = [1, 1, 1]} : vector<2x18x16xbf16> to vector<2x16x16xbf16>
    %6 = vector.extract_strided_slice %3 {offsets = [0, 2, 0], sizes = [2, 16, 16], strides = [1, 1, 1]} : vector<2x18x16xbf16> to vector<2x16x16xbf16>
    %7 = tpu.concatenate %4, %5, %6 in 2 : vector<2x16x16xbf16>, vector<2x16x16xbf16>, vector<2x16x16xbf16> -> vector<2x16x48xbf16>
    %8 = vector.shape_cast %7 : vector<2x16x48xbf16> to vector<32x48xbf16>
    %c0_2 = arith.constant 0 : index
    %c0_3 = arith.constant 0 : index
    %9 = vector.load %arg2[%c0_2, %c0_3] : memref<48x32xbf16, #tpu.memory_space<vmem>>, vector<48x32xbf16>
    %cst_4 = arith.constant dense<0.000000e+00> : vector<32x32xf32>
    %10 = tpu.matmul %8, %9, %cst_4 {dimension_numbers = #tpu.dot_dimension_numbers<[1], [0], [0], [1], [0, 0, 1, 1], [], []>} : vector<32x48xbf16>, vector<48x32xbf16>, vector<32x32xf32> -> vector<32x32xf32>
    %c0_5 = arith.constant 0 : index
    %c0_6 = arith.constant 0 : index
    %11 = vector.load %arg3[%c0_5, %c0_6] : memref<1x32xf32, #tpu.memory_space<vmem>>, vector<1x32xf32>
    %12 = vector.broadcast %11 : vector<1x32xf32> to vector<32x32xf32>
    %13 = arith.mulf %10, %12 : vector<32x32xf32>
    %c0_7 = arith.constant 0 : index
    %c0_8 = arith.constant 0 : index
    %14 = vector.load %arg4[%c0_7, %c0_8] : memref<1x32xf32, #tpu.memory_space<vmem>>, vector<1x32xf32>
    %15 = vector.broadcast %14 : vector<1x32xf32> to vector<32x32xf32>
    %16 = arith.addf %13, %15 : vector<32x32xf32>
    %cst_9 = arith.constant 0.000000e+00 : f32
    %17 = vector.broadcast %cst_9 : f32 to vector<32x32xf32>
    %18 = arith.maximumf %16, %17 : vector<32x32xf32>
    %19 = vector.shape_cast %18 : vector<32x32xf32> to vector<2x16x32xf32>
    %c0_10 = arith.constant 0 : index
    %c0_11 = arith.constant 0 : index
    %c0_12 = arith.constant 0 : index
    %20 = vector.load %arg5[%c0_10, %c0_11, %c0_12] : memref<2x16x32xf32, #tpu.memory_space<vmem>>, vector<2x16x32xf32>
    tpu.vector_store %arg5[%c0_10, %c0_11, %c0_12], %19 {strides = array<i32>} : memref<2x16x32xf32, #tpu.memory_space<vmem>>, vector<2x16x32xf32>,
    return
  }
  func.func @transform_0(%arg0: i32) -> (i32, i32, i32) {
    %c0_i32 = arith.constant 0 : i32
    %c0_i32_0 = arith.constant 0 : i32
    %c0_i32_1 = arith.constant 0 : i32
    return %arg0, %c0_i32, %c0_i32_0 : i32, i32, i32
  }
  func.func @transform_1(%arg0: i32) -> (i32, i32) {
    %c0_i32 = arith.constant 0 : i32
    %c0_i32_0 = arith.constant 0 : i32
    %c0_i32_1 = arith.constant 0 : i32
    return %c0_i32, %c0_i32_0 : i32, i32
  }
  func.func @transform_2(%arg0: i32) -> (i32, i32) {
    %c0_i32 = arith.constant 0 : i32
    %c0_i32_0 = arith.constant 0 : i32
    %c0_i32_1 = arith.constant 0 : i32
    return %c0_i32, %c0_i32_0 : i32, i32
  }
  func.func @transform_3(%arg0: i32) -> (i32, i32) {
    %c0_i32 = arith.constant 0 : i32
    %c0_i32_0 = arith.constant 0 : i32
    %c0_i32_1 = arith.constant 0 : i32
    return %c0_i32, %c0_i32_0 : i32, i32
  }
  func.func @transform_4(%arg0: i32) -> (i32, i32, i32) {
    %c0_i32 = arith.constant 0 : i32
    %c0_i32_0 = arith.constant 0 : i32
    %c0_i32_1 = arith.constant 0 : i32
    return %arg0, %c0_i32, %c0_i32_0 : i32, i32, i32
  }
}

</mosaic_0001>

<bundles_post_ra>
// kernel: conv_layer_forward.2
= control target key start
LH: loop header
LB: loop body
LE: loop exit
PB: predicated region body
PF: predicated region fallthrough
CT: control target
= control target key end

     0   :  { %vm37_vm0 = vsmask.f32 256  ;;  %vm36_vm1 = vcmask 1040384   ;;  %vm76_vm3 = vcmask 1046528   ;;  %vm43_vm4 = vsmask.f32 7424  ;;  %s307_s0 = inlined_call_operand.vmem [shape: f32[2,16,16], index: 0, kind: input, shape index: {}]   ;;  %s308_s1 = inlined_call_operand.vmem [shape: bf16[48,32], index: 1, kind: input, shape index: {}]   ;;  %s309_s2 = inlined_call_operand.vmem [shape: f32[8,32], index: 2, kind: output, shape index: {}]  }
   0x1   :  { %v12_v0 = vld [vmem:[%s307_s0] sm:$0xff]  ;;  %v13_v1 = vld [vmem:[%s307_s0 + $0x8] sm:$0xff]  ;;  %v14_v3 = vld [vmem:[%s307_s0 + $0x10] sm:$0xff]  ;;  %s240_s22 = smov 16   ;;  %vm87_vm5 = vcmask 130048   ;;  %vm92_vm6 = vcmask 261120  }
   0x2   :  { %v16_v2 = vpack.c.bf16 %v13_v1, %v12_v0  ;;  %v15_v4 = vld [vmem:[%s307_s0 + $0x18] sm:$0xff]  ;;  %v236_v6 = vld [vmem:[%s308_s1] sm:$0xff]   ;;  %v237_v9 = vld [vmem:[%s308_s1 + $0x8] sm:$0xff]   ;;  %vm121_vm7 = vcmask 392192   ;;  %vm207_vm8 = vcmask 1041408  }
   0x3   :  { %v17_v5 = vpack.c.bf16 %v15_v4, %v14_v3  ;;  %224 = vmatprep.subr.bf16.mxu0 %v236_v6  ;;  %vm275_vm2 = vmand %vm36_vm1, %vm37_vm0  ;;  %v238_v15 = vld [vmem:[%s308_s1 + $0x10] sm:$0xff]   ;;  %s239_s1 = smov 32  }
   0x4   :  { %v19_v7 = vshrl.u32 %v16_v2, 16  ;;  %v22_v8 = vshll.u32 %v16_v2, 16  ;;  %225 = vmatpush3.bf16.msra.mxu0 %v236_v6 }
   0x5   :  { %v26_v10 = vshrl.u32 %v17_v5, 16  ;;  %v29_v11 = vshll.u32 %v17_v5, 16  ;;  %226 = vmatprep.subr.bf16.mxu0 %v237_v9 }
   0x6   :  { %v21_v12 = vrot.slane %v19_v7, 7 }
   0x7   :  { %v28_v14 = vrot.slane %v26_v10, 7 }
   0x8   :  { %v24_v16 = vor.u32 %v22_v8, %v21_v12  ;;  %v41_v17 = vsel %vm275_vm2, %v21_v12, 0  ;;  %227 = vmatpush3.bf16.msra.mxu0 %v237_v9 }
   0x9   :  { %v52_v18 = vshll.u32 %v41_v17, 16  ;;  %v78_v19 = vrot.slane %v41_v17, 1  ;;  %v31_v20 = vor.u32 %v29_v11, %v28_v14  ;;  %v42_v21 = vsel %vm275_vm2, %v28_v14, 0  ;;  %228 = vmatprep.subr.bf16.mxu0 %v238_v15 }
   0xa   :  { %v39_v22 = vsel %vm275_vm2, 0, %v24_v16  ;;  %v64_v26 = vshll.u32 %v42_v21, 16  ;;  %v81_v29 = vrot.slane %v42_v21, 1 }
   0xb   :  { %v45_v23 = vshrl.u32 %v39_v22, 16  ;;  %v47_v24 = vshll.u32 %v39_v22, 16  ;;  %v77_v25 = vrot.slane %v39_v22, 1  ;;  %v54_v27 = vrot.slane %v52_v18, 1 }
   0xc   :  { %v40_v28 = vsel %vm275_vm2, 0, %v31_v20  ;;  %229 = vmatpush3.bf16.msra.mxu0 %v238_v15  ;;  %v66_v37 = vrot.slane %v64_v26, 1 }
   0xd   :  { %v49_v30 = vrot.slane %v47_v24, 1  ;;  %v79_v31 = vsel %vm76_vm3, %v77_v25, %v78_v19  ;;  %v57_v32 = vshrl.u32 %v40_v28, 16  ;;  %v59_v33 = vshll.u32 %v40_v28, 16 }
   0xe   :  { %83 = vrot.lane.b32.xlu1 %v79_v31, %s239_s1  ;;  %v80_v34 = vrot.slane %v40_v28, 1 }
   0xf   :  { %v50_v35 = vor.u32 %v49_v30, %v45_v23  ;;  %v61_v36 = vrot.slane %v59_v33, 1 }
  0x10   :  { %v82_v38 = vsel %vm76_vm3, %v80_v34, %v81_v29 }
  0x11   :  { %v55_v39 = vsel %vm43_vm4, %v50_v35, %v54_v27  ;;  %v62_v40 = vor.u32 %v61_v36, %v57_v32 }
  0x12   :  { %68 = vrot.lane.b32.xlu0 %v55_v39, %s240_s22  ;;  %85 = vrot.lane.b32.xlu1 %v82_v38, %s239_s1 }
  0x13   :  { %v67_v41 = vsel %vm43_vm4, %v62_v40, %v66_v37 }
  0x16   :  { %70 = vrot.lane.b32.xlu0 %v67_v41, %s240_s22 }
  0x80   :  { %v84_v42 = vpop.permute.xlu1 %83 }
  0x84   :  { %v69_v43 = vpop.permute.xlu0 %68  ;;  %v86_v46 = vpop.permute.xlu1 %85 }
  0x85   :  { %v89_v44 = vsel %vm87_vm5, %v39_v22, %v69_v43 }
  0x86   :  { %v94_v45 = vsel %vm92_vm6, %v89_v44, %v84_v42 }
  0x87   :  { %230 = vmatprep.mubr.msk.bf16.mxu0 %vm121_vm7, %v94_v45 }
  0x88   :  { %v71_v47 = vpop.permute.xlu0 %70 }
  0x89   :  { %v91_v48 = vsel %vm87_vm5, %v40_v28, %v71_v47 }
  0x8a   :  { %v96_v49 = vsel %vm92_vm6, %v91_v48, %v86_v46 }
  0x8b   :  { %231 = vmatmul.mubr.msk.bf16.vlgmr.msra.gmra.mrb[0].mxu0 %vm121_vm7, %v96_v49 }
 0x15e   :  { %v232_v50 = vpop.f32.mrb[0].mxu0 }
 0x15f   :  { %v160_v51 = vpop.f32.mrb[1].mxu0  ;;  %v190_v55 = vmul.f32 %v232_v50, %v232_v50  ;;  %v178_v60 = vsel %vm92_vm6, %v232_v50, 0.0 }
 0x160   :  { %v188_v52 = vmul.f32 %v160_v51, %v160_v51  ;;  %v233_v53 = vpop.f32.mrb[2].mxu0  ;;  %v175_v56 = vsel %vm92_vm6, %v160_v51, 0.0 }
 0x161   :  { %v163_v54 = vpop.f32.mrb[3].mxu0  ;;  %v191_v62 = vmul.f32 %v233_v53, %v233_v53  ;;  %v195_v2 = vsel %vm92_vm6, %v190_v55, 0.0  ;;  %v180_v3 = vsel %vm92_vm6, %v233_v53, 0.0 }
 0x162   :  { %v176_v57 = vsel %vm92_vm6, %v163_v54, 0.0  ;;  %v189_v58 = vmul.f32 %v163_v54, %v163_v54  ;;  %v192_v61 = vsel %vm92_vm6, %v188_v52, 0.0 }
 0x163   :  { %v177_v59 = vadd.f32 %v176_v57, %v175_v56  ;;  %v197_v6 = vsel %vm92_vm6, %v191_v62, 0.0 }
 0x164   :  { %v193_v63 = vsel %vm92_vm6, %v189_v58, 0.0 }
 0x165   :  { %v179_v0 = vadd.f32 %v178_v60, %v177_v59  ;;  %v194_v1 = vadd.f32 %v193_v63, %v192_v61 }
 0x167   :  { %v181_v4 = vadd.f32 %v180_v3, %v179_v0  ;;  %v196_v5 = vadd.f32 %v195_v2, %v194_v1 }
 0x169   :  { %v182_v7 = vrot.slane %v181_v4, 4  ;;  %v198_v8 = vadd.f32 %v197_v6, %v196_v5 }
 0x16b   :  { %v183_v9 = vadd.f32 %v182_v7, %v181_v4  ;;  %v199_v10 = vrot.slane %v198_v8, 4 }
 0x16d   :  { %v184_v11 = vrot.slane %v183_v9, 2  ;;  %v200_v12 = vadd.f32 %v199_v10, %v198_v8 }
 0x16f   :  { %v185_v13 = vadd.f32 %v184_v11, %v183_v9  ;;  %v201_v14 = vrot.slane %v200_v12, 2 }
 0x171   :  { %v186_v15 = vrot.slane %v185_v13, 1  ;;  %v202_v16 = vadd.f32 %v201_v14, %v200_v12 }
 0x173   :  { %v203_v17 = vrot.slane %v202_v16, 1  ;;  %v187_v18 = vadd.f32 %v186_v15, %v185_v13 }
 0x175   :  { %v204_v19 = vadd.f32 %v203_v17, %v202_v16 }
 0x177   :  { %v206_v20 = vsel %vm36_vm1, %v187_v18, %v204_v19 }
 0x178   :  { %v208_v21 = vsel %vm207_vm8, %v206_v20, 0.0 }
 0x179   :  { %209 = vst.msk [vmem:[%s309_s2] sm:$0xff] %vm92_vm6, %v208_v21 }

// kernel: conv_layer_forward.3
= control target key start
LH: loop header
LB: loop body
LE: loop exit
PB: predicated region body
PF: predicated region fallthrough
CT: control target
= control target key end

     0   :  { %vm44_vm0 = vsmask.f32 256  ;;  %vm43_vm1 = vcmask 1040384   ;;  %s371_s0 = inlined_call_operand.vmem [shape: f32[2,16,16], index: 0, kind: input, shape index: {}]   ;;  %s372_s1 = inlined_call_operand.vmem [shape: bf16[48,32], index: 1, kind: input, shape index: {}]   ;;  %s373_s2 = inlined_call_operand.vmem [shape: f32[1,32], index: 2, kind: input, shape index: {}]   ;;  %s374_s3 = inlined_call_operand.vmem [shape: f32[1,32], index: 3, kind: input, shape index: {}]   ;;  %s375_s4 = inlined_call_operand.hbm [shape: f32[2,16,32], index: 4, kind: output, shape index: {}]  }
   0x1   :  { %v19_v0 = vld [vmem:[%s371_s0] sm:$0xff]  ;;  %v20_v1 = vld [vmem:[%s371_s0 + $0x8] sm:$0xff]  ;;  %v21_v3 = vld [vmem:[%s371_s0 + $0x10] sm:$0xff] }
   0x2   :  { %v23_v2 = vpack.c.bf16 %v20_v1, %v19_v0  ;;  %v22_v4 = vld [vmem:[%s371_s0 + $0x18] sm:$0xff]  ;;  %v255_v6 = vld [vmem:[%s372_s1] sm:$0xff]   ;;  %v256_v11 = vld [vmem:[%s372_s1 + $0x8] sm:$0xff]  }
   0x3   :  { %v24_v5 = vpack.c.bf16 %v22_v4, %v21_v3  ;;  %240 = vmatprep.subr.bf16.mxu0 %v255_v6  ;;  %vm330_vm2 = vmand %vm43_vm1, %vm44_vm0  ;;  %v257_v15 = vld [vmem:[%s372_s1 + $0x10] sm:$0xff]  }
   0x4   :  { %v26_v7 = vshrl.u32 %v23_v2, 16  ;;  %v29_v8 = vshll.u32 %v23_v2, 16  ;;  %241 = vmatpush3.bf16.msra.mxu0 %v255_v6 }
   0x5   :  { %v33_v9 = vshrl.u32 %v24_v5, 16  ;;  %v36_v10 = vshll.u32 %v24_v5, 16  ;;  %242 = vmatprep.subr.bf16.mxu0 %v256_v11 }
   0x6   :  { %v28_v12 = vrot.slane %v26_v7, 7 }
   0x7   :  { %v35_v14 = vrot.slane %v33_v9, 7 }
   0x8   :  { %9 = vsyncpa [#allocation3], 0  ;;  %v31_v16 = vor.u32 %v29_v8, %v28_v12  ;;  %v48_v17 = vsel %vm330_vm2, %v28_v12, 0  ;;  %vm83_vm3 = vcmask 1046528   ;;  %243 = vmatpush3.bf16.msra.mxu0 %v256_v11  ;;  %vm50_vm4 = vsmask.f32 7424 }
   0x9   :  { %v59_v18 = vshll.u32 %v48_v17, 16  ;;  %v85_v19 = vrot.slane %v48_v17, 1  ;;  %v38_v20 = vor.u32 %v36_v10, %v35_v14  ;;  %v49_v21 = vsel %vm330_vm2, %v35_v14, 0  ;;  %244 = vmatprep.subr.bf16.mxu0 %v257_v15  ;;  %s282_s1 = smov 32   ;;  %s283_s28 = smov 16  }
   0xa   :  { %v46_v22 = vsel %vm330_vm2, 0, %v31_v16  ;;  %v71_v26 = vshll.u32 %v49_v21, 16  ;;  %v88_v29 = vrot.slane %v49_v21, 1  ;;  %vm94_vm5 = vcmask 130048   ;;  %v233_v50 = vld [vmem:[%s373_s2] ss:$0 sm:$0xff] }
   0xb   :  { %v52_v23 = vshrl.u32 %v46_v22, 16  ;;  %v54_v24 = vshll.u32 %v46_v22, 16  ;;  %v84_v25 = vrot.slane %v46_v22, 1  ;;  %v61_v27 = vrot.slane %v59_v18, 1  ;;  %v234_v52 = vld [vmem:[%s374_s3] ss:$0 sm:$0xff] }
   0xc   :  { %v47_v28 = vsel %vm330_vm2, 0, %v38_v20  ;;  %245 = vmatpush3.bf16.msra.mxu0 %v257_v15  ;;  %v73_v37 = vrot.slane %v71_v26, 1  ;;  %vm99_vm6 = vcmask 261120   ;;  %vm128_vm7 = vcmask 392192   ;;  %s284_s7 = smov [#allocation2]  }
   0xd   :  { %v56_v30 = vrot.slane %v54_v24, 1  ;;  %v86_v31 = vsel %vm83_vm3, %v84_v25, %v85_v19  ;;  %v64_v32 = vshrl.u32 %v47_v28, 16  ;;  %v66_v33 = vshll.u32 %v47_v28, 16  ;;  %s217_s8 = sshll.u32 %s284_s7, 4  ;;  %s218_s8 = int_to_ptr.vmem [resolvable:$true] %s217_s8 }
   0xe   :  { %90 = vrot.lane.b32.xlu1 %v86_v31, %s282_s1  ;;  %v87_v34 = vrot.slane %v47_v28, 1  ;;  %s258_s2 = scalar_lea.vmem %s218_s8, 512  ;;  %p263_p1 = scmp.lt.s32.totalorder %s218_s8, %s218_s8 }
   0xf   :  { %v57_v35 = vor.u32 %v56_v30, %v52_v23  ;;  %v68_v36 = vrot.slane %v66_v33, 1  ;;  %p259_p0 = scmp.ne.s32.totalorder %s218_s8, %s258_s2  ;;  %p264_p2 = scmp.lt.s32.totalorder %s258_s2, %s258_s2 }
  0x10   :  { %v89_v38 = vsel %vm83_vm3, %v87_v34, %v88_v29 }
  0x11   :  { %v62_v39 = vsel %vm50_vm4, %v57_v35, %v61_v27  ;;  %v69_v40 = vor.u32 %v68_v36, %v64_v32  ;;  %p265_p3 = por %p264_p2, %p263_p1 }
  0x12   :  { %75 = vrot.lane.b32.xlu0 %v62_v39, %s283_s28  ;;  %92 = vrot.lane.b32.xlu1 %v89_v38, %s282_s1 }
  0x13   :  { %v74_v41 = vsel %vm50_vm4, %v69_v40, %v73_v37  ;;  %p266_p4 = pnand %p265_p3, %p259_p0 }
  0x16   :  { %77 = vrot.lane.b32.xlu0 %v74_v41, %s283_s28 }
  0x80   :  { %v91_v42 = vpop.permute.xlu1 %90 }
  0x84   :  { %v76_v43 = vpop.permute.xlu0 %75  ;;  %v93_v46 = vpop.permute.xlu1 %92 }
  0x85   :  { %v96_v44 = vsel %vm94_vm5, %v46_v22, %v76_v43 }
  0x86   :  { %v101_v45 = vsel %vm99_vm6, %v96_v44, %v91_v42 }
  0x87   :  { %246 = vmatprep.mubr.msk.bf16.mxu0 %vm128_vm7, %v101_v45 }
  0x88   :  { %v78_v47 = vpop.permute.xlu0 %77 }
  0x89   :  { %v98_v48 = vsel %vm94_vm5, %v47_v28, %v78_v47 }
  0x8a   :  { %v103_v49 = vsel %vm99_vm6, %v98_v48, %v93_v46 }
  0x8b   :  { %247 = vmatmul.mubr.msk.bf16.vlgmr.msra.gmra.mrb[0].mxu0 %vm128_vm7, %v103_v49 }
 0x15e   :  { %v248_v51 = vpop.f32.mrb[0].mxu0 }
 0x15f   :  { %v191_v53 = vmul.f32 %v248_v51, %v233_v50  ;;  %v167_v54 = vpop.f32.mrb[1].mxu0 }
 0x160   :  { %v189_v55 = vmul.f32 %v233_v50, %v167_v54  ;;  %v249_v56 = vpop.f32.mrb[2].mxu0 }
 0x161   :  { %v202_v57 = vadd.f32 %v234_v52, %v191_v53  ;;  %v192_v58 = vmul.f32 %v249_v56, %v233_v50  ;;  %v170_v59 = vpop.f32.mrb[3].mxu0 }
 0x162   :  { %v200_v60 = vadd.f32 %v234_v52, %v189_v55  ;;  %v190_v61 = vmul.f32 %v233_v50, %v170_v59 }
 0x163   :  { %v206_v62 = vmax.f32 %v202_v57, 0.0  ;;  %v203_v63 = vadd.f32 %v234_v52, %v192_v58 }
 0x164   :  { %v204_v0 = vmax.f32 %v200_v60, 0.0  ;;  %v201_v1 = vadd.f32 %v234_v52, %v190_v61 }
 0x165   :  { %210 = vst.msk [vmem:[#allocation2 + $0x10] sm:$0xff] %vm99_vm6, %v206_v62  ;;  %v207_v2 = vmax.f32 %v203_v63, 0.0 }
 0x166   :  { %208 = vst.msk [vmem:[#allocation2] sm:$0xff] %vm99_vm6, %v204_v0  ;;  %v205_v3 = vmax.f32 %v201_v1, 0.0 }
 0x167   :  { %211 = vst.msk [vmem:[#allocation2 + $0x18] sm:$0xff] %vm99_vm6, %v207_v2 }
 0x168   :  { %209 = vst.msk [vmem:[#allocation2 + $0x8] sm:$0xff] %vm99_vm6, %v205_v3 }
 0x169   :  { %269 = shalt.err (!%p266_p4)
}
 0x16a   :  { %s270_s10 = scalar_lea.hbm %s375_s4, 512 }
 0x16b   :  { %p271_p5 = scmp.ne.s32.totalorder %s375_s4, %s270_s10  ;;  %p274_p6 = scmp.lt.u32.totalorder %s270_s10, %s375_s4 }
 0x16d   :  { %p276_p7 = pnand %p274_p6, %p271_p5 }
 0x16f   :  { %279 = shalt.err (!%p276_p7)
}
 0x170   :  { %s285_s15 = smov 128   ;;  %s286_s16 = smov 8  }
 0x171   :  { %223 = dma.vmem_to_hbm [thread:$0]  %s218_s8, 512, %s375_s4, [#allocation3], %s285_s15, %s285_s15, %s286_s16  }
 0x172   :  { %280 = dma.done.wait [#allocation3], 512  }
 0x173   :  { %281 = vsyncadd [#allocation3], 4294966784 }
 0x174   :  { %227 = vsyncpa [#allocation3], 1 }

</bundles_post_ra>
